<compile_context>
chip_gen: v6e
topology: v6e:2x2x1
jax: 0.10.0
libtpu: 0.0.40
codegen_flags: <defaults>
</compile_context>

<pallas_src>
import math

import jax
import jax.numpy as jnp
from jax.experimental import pallas as pl
from jax.experimental.pallas import tpu as pltpu

LN_EPS = 1e-5
SQRT2 = math.sqrt(2.0)
OUT_LANES = 8            # lane width of the fused-head output slab
TB_MAX = 2048            # max batch rows per grid step


# --------------------------- elementwise helpers -----------------------------
def _erf(x):
    # Abramowitz & Stegun 7.1.26 (max abs err 1.5e-7).  Uses only exp/mul/add,
    # so it is guaranteed to lower on Mosaic, yet matches PyTorch's exact-erf
    # GELU to ~1e-7.  The extra VALU/EUP work is hidden under DMA/step overhead.
    p = 0.3275911
    a1, a2, a3, a4, a5 = 0.254829592, -0.284496736, 1.421413741, -1.453152027, 1.061405429
    ax = jnp.abs(x)
    t = 1.0 / (1.0 + p * ax)
    poly = ((((a5 * t + a4) * t + a3) * t + a2) * t + a1) * t
    y = 1.0 - poly * jnp.exp(-ax * ax)
    return jnp.where(x < 0.0, -y, y)


def _gelu_exact(x):
    # PyTorch nn.GELU() default (erf formulation).
    return 0.5 * x * (1.0 + _erf(x * (1.0 / SQRT2)))


def _layernorm(x, w, b):
    mu = jnp.mean(x, axis=-1, keepdims=True)
    xc = x - mu
    var = jnp.mean(xc * xc, axis=-1, keepdims=True)
    return xc * jax.lax.rsqrt(var + LN_EPS) * w + b


# --------------------------------- kernel ------------------------------------
def hypernet_kernel(
    h_ref,                     # (TB, D)        batch tile
    w1_ref, b1_ref,            # (D, D2), (1, D2)
    ln1w_ref, ln1b_ref,        # (1, D2)
    w2_ref, b2_ref,            # (D2, D4), (1, D4)
    ln2w_ref, ln2b_ref,        # (1, D4)
    wh_ref,                    # (D4, 8)  fused heads, zero-padded lanes 3..7
    consts_ref,                # (8, 8): row0=head bias, row1=lo, row2=hi,
                               #         row3=bounds_min, row4=(max - min)
    out_ref,                   # (TB, 8)  output slab; lanes 0..2 are valid
):
    x = h_ref[...]

    # --- core MLP ------------------------------------------------------------
    w1 = w1_ref[...]
    h1 = jnp.dot(x.astype(w1.dtype), w1,
                 preferred_element_type=jnp.float32) + b1_ref[...]
    h1 = _layernorm(h1, ln1w_ref[...], ln1b_ref[...])
    h1 = _gelu_exact(h1)
    # Dropout(0.1): identity in eval mode.

    w2 = w2_ref[...]
    h2 = jnp.dot(h1.astype(w2.dtype), w2,
                 preferred_element_type=jnp.float32) + b2_ref[...]
    h2 = _layernorm(h2, ln2w_ref[...], ln2b_ref[...])
    feats = _gelu_exact(h2)

    # --- fused parameter heads (delta, lambda, moe_temp in lanes 0..2) --------
    wh = wh_ref[...]
    raw = jnp.dot(feats.astype(wh.dtype), wh,
                  preferred_element_type=jnp.float32) + consts_ref[0:1, :]
    bounded = jnp.clip(raw, consts_ref[1:2, :], consts_ref[2:3, :])
    sig = 1.0 / (1.0 + jnp.exp(-bounded))                  # exact sigmoid
    out_ref[...] = consts_ref[3:4, :] + consts_ref[4:5, :] * sig


# ------------------------------- host wrapper --------------------------------
def _round_up(x, m):
    return -(-x // m) * m


def _pick_batch_tile(B):
    if B <= 8:
        return B                      # single full-array block (exact)
    # >= 2 grid steps whenever possible so ("parallel",) can shard the batch
    # across both v7x TensorCores; capped at TB_MAX to bound VMEM per step.
    return min(TB_MAX, _round_up(pl.cdiv(B, 2), 8))


def pack_head_constants(params, phase_center, phase_radius, trust_radii,
                        bounds_min, bounds_max):
    """Pack per-head constants once (hoisted out of the per-call wrapper)."""
    radius = (phase_radius * trust_radii).astype(jnp.float32)
    rows = jnp.stack([
        params["bh"][0].astype(jnp.float32),               # head bias
        phase_center.astype(jnp.float32) - radius,         # clamp lo
        phase_center.astype(jnp.float32) + radius,         # clamp hi
        bounds_min.astype(jnp.float32),                    # min
        (bounds_max - bounds_min).astype(jnp.float32),     # span
    ])                                                     # (5, 3)
    consts = jnp.zeros((8, OUT_LANES), jnp.float32).at[:5, :3].set(rows)
    wh = params["wh"]
    wh_pad = jnp.pad(wh, ((0, 0), (0, OUT_LANES - wh.shape[1])))
    return wh_pad, consts


def hypernetwork_forward(h_t, params, wh_pad, consts, *, vmem_limit_bytes=None):
    B, D = h_t.shape
    tb = _pick_batch_tile(B)
    grid = (pl.cdiv(B, tb),)

    resident_inputs = (
        params["w1"], params["b1"], params["ln1_w"], params["ln1_b"],
        params["w2"], params["b2"], params["ln2_w"], params["ln2_b"],
        wh_pad, consts,
    )

    def resident_spec(arr):
        # Full-array block + constant index map -> stays resident in VMEM for
        # the whole grid.  For large d_model on v7x (64 MiB VMEM / 32 MiB
        # scoped), add pipeline_mode=pl.Buffered(1) here and/or pass bf16
        # weights to halve the resident footprint; at d_model=32 the weights
        # are ~3 KB so it is moot.
        return pl.BlockSpec(arr.shape, lambda i, n=arr.ndim: (0,) * n)

    in_specs = [pl.BlockSpec((tb, D), lambda i: (i, 0))] + \
               [resident_spec(a) for a in resident_inputs]

    out = pl.pallas_call(
        hypernet_kernel,
        out_shape=jax.ShapeDtypeStruct((B, OUT_LANES), jnp.float32),
        grid=grid,
        in_specs=in_specs,
        out_specs=pl.BlockSpec((tb, OUT_LANES), lambda i: (i, 0)),
        compiler_params=pltpu.CompilerParams(
            dimension_semantics=("parallel",),
            vmem_limit_bytes=vmem_limit_bytes,
        ),
    )(h_t, *resident_inputs)

    delta = out[:, 0:1]
    lambda_h = out[:, 1:2]
    moe_temp = out[:, 2:3]
    return delta, lambda_h, moe_temp


# ------------------------- parameter construction ----------------------------
def init_params(key, d_model):
    d2, d4 = d_model // 2, d_model // 4
    ks = jax.random.split(key, 8)

    def lin(kw, kb, fan_in, fan_out):
        bound = 1.0 / math.sqrt(fan_in)
        w = jax.random.uniform(kw, (fan_in, fan_out), jnp.float32, -bound, bound)
        b = jax.random.uniform(kb, (1, fan_out), jnp.float32, -bound, bound)
        return w, b

    w1, b1 = lin(ks[0], ks[1], d_model, d2)
    w2, b2 = lin(ks[2], ks[3], d2, d4)

    # Fused head weights (d4, 3). Head biases follow ParameterHead.__init__:
    # bias = log((init - min) / (max - init))
    bound = 1.0 / math.sqrt(d4)
    wh = jax.random.uniform(ks[4], (d4, 3), jnp.float32, -bound, bound)
    bh = jnp.array([[math.log((1.0 - 0.1) / (2.0 - 1.0)),     # delta
                     math.log((0.5 - 0.01) / (0.99 - 0.5)),   # lambda
                     math.log((1.0 - 0.5) / (1.5 - 1.0))]],   # moe_temp
                   dtype=jnp.float32)

    return {
        "w1": w1, "b1": b1,
        "ln1_w": jnp.ones((1, d2), jnp.float32), "ln1_b": jnp.zeros((1, d2), jnp.float32),
        "w2": w2, "b2": b2,
        "ln2_w": jnp.ones((1, d4), jnp.float32), "ln2_b": jnp.zeros((1, d4), jnp.float32),
        "wh": wh, "bh": bh,
    }


def reference_forward(h_t, params, center, radius, trust_radii, bmin, bmax):
    """Pure-JAX reference with exact PyTorch semantics (erf GELU, exact sigmoid)."""
    def ln(x, w, b):
        mu = jnp.mean(x, -1, keepdims=True)
        var = jnp.mean((x - mu) ** 2, -1, keepdims=True)
        return (x - mu) / jnp.sqrt(var + LN_EPS) * w + b

    def gelu(x):
        return 0.5 * x * (1.0 + jax.lax.erf(x * (1.0 / SQRT2)))

    h1 = gelu(ln(h_t @ params["w1"] + params["b1"], params["ln1_w"], params["ln1_b"]))
    feats = gelu(ln(h1 @ params["w2"] + params["b2"], params["ln2_w"], params["ln2_b"]))
    raw = feats @ params["wh"] + params["bh"]
    r = (radius * trust_radii).reshape(1, 3)
    bounded = jnp.clip(raw, center.reshape(1, 3) - r, center.reshape(1, 3) + r)
    return bmin.reshape(1, 3) + (bmax - bmin).reshape(1, 3) * jax.nn.sigmoid(bounded)


if __name__ == "__main__":
    D_MODEL = 32
    key = jax.random.PRNGKey(0)
    k_in, k_par, k_big = jax.random.split(key, 3)
    params = init_params(k_par, D_MODEL)

    # phase = 'exploitation'  (delta, lambda, moe_temp)
    phase_center = jnp.array([0.8, 0.3, 0.8], jnp.float32)
    phase_radius = jnp.array([0.3, 0.2, 0.2], jnp.float32)
    trust_radii = jnp.ones((3,), jnp.float32)                 # freshly-registered buffer
    bounds_min = jnp.array([0.1, 0.01, 0.5], jnp.float32)
    bounds_max = jnp.array([2.0, 0.99, 1.5], jnp.float32)

    # Pack head constants / padded head weights ONCE, reused across calls.
    wh_pad, consts = pack_head_constants(params, phase_center, phase_radius,
                                         trust_radii, bounds_min, bounds_max)

    # --- small case (single grid step, full-array blocks) ---------------------
    B = 2
    h_t = jax.random.normal(k_in, (B, D_MODEL), dtype=jnp.float32)
    delta, lambda_h, moe_temp = hypernetwork_forward(h_t, params, wh_pad, consts)
    jax.block_until_ready((delta, lambda_h, moe_temp))
    got = jnp.concatenate([delta, lambda_h, moe_temp], axis=1)
    assert got.shape == (B, 3)

    ref = reference_forward(h_t, params, phase_center, phase_radius,
                            trust_radii, bounds_min, bounds_max)
    assert jnp.allclose(got, ref, atol=1e-4, rtol=1e-4), (got, ref)

    # --- larger case: >=2 grid steps + masked partial trailing block ----------
    B2 = 1037   # not a multiple of the chosen tile -> exercises masked stores
    h_big = jax.random.normal(k_big, (B2, D_MODEL), dtype=jnp.float32)
    d2, l2, m2 = hypernetwork_forward(h_big, params, wh_pad, consts)
    jax.block_until_ready((d2, l2, m2))
    got2 = jnp.concatenate([d2, l2, m2], axis=1)
    ref2 = reference_forward(h_big, params, phase_center, phase_radius,
                             trust_radii, bounds_min, bounds_max)
    assert got2.shape == (B2, 3)
    assert jnp.allclose(got2, ref2, atol=1e-4, rtol=1e-4)

    print("KERNEL_OK")
</pallas_src>

<mosaic_0001>
module attributes {stable_mosaic.version = 11 : i64} {
  func.func @hypernet_kernel(%arg0: i32, %arg1: memref<2x32xf32, #tpu.memory_space<vmem>>, %arg2: memref<32x16xf32, #tpu.memory_space<vmem>>, %arg3: memref<1x16xf32, #tpu.memory_space<vmem>>, %arg4: memref<1x16xf32, #tpu.memory_space<vmem>>, %arg5: memref<1x16xf32, #tpu.memory_space<vmem>>, %arg6: memref<16x8xf32, #tpu.memory_space<vmem>>, %arg7: memref<1x8xf32, #tpu.memory_space<vmem>>, %arg8: memref<1x8xf32, #tpu.memory_space<vmem>>, %arg9: memref<1x8xf32, #tpu.memory_space<vmem>>, %arg10: memref<8x8xf32, #tpu.memory_space<vmem>>, %arg11: memref<8x8xf32, #tpu.memory_space<vmem>>, %arg12: memref<2x8xf32, #tpu.memory_space<vmem>>) attributes {dimension_semantics = [#tpu.dimension_semantics<parallel>], iteration_bounds = array<i64: 1>, scalar_prefetch = 0 : i64, scratch_operands = 0 : i64, tpu.core_type = #tpu.core_type<tc>, window_params = [{transform_indices = @transform_0, window_bounds = array<i64: 2, 32>}, {pipeline_mode = #tpu.pipeline_mode<synchronous>, transform_indices = @transform_1, window_bounds = array<i64: 32, 16>}, {pipeline_mode = #tpu.pipeline_mode<synchronous>, transform_indices = @transform_2, window_bounds = array<i64: 1, 16>}, {pipeline_mode = #tpu.pipeline_mode<synchronous>, transform_indices = @transform_3, window_bounds = array<i64: 1, 16>}, {pipeline_mode = #tpu.pipeline_mode<synchronous>, transform_indices = @transform_4, window_bounds = array<i64: 1, 16>}, {pipeline_mode = #tpu.pipeline_mode<synchronous>, transform_indices = @transform_5, window_bounds = array<i64: 16, 8>}, {pipeline_mode = #tpu.pipeline_mode<synchronous>, transform_indices = @transform_6, window_bounds = array<i64: 1, 8>}, {pipeline_mode = #tpu.pipeline_mode<synchronous>, transform_indices = @transform_7, window_bounds = array<i64: 1, 8>}, {pipeline_mode = #tpu.pipeline_mode<synchronous>, transform_indices = @transform_8, window_bounds = array<i64: 1, 8>}, {pipeline_mode = #tpu.pipeline_mode<synchronous>, transform_indices = @transform_9, window_bounds = array<i64: 8, 8>}, {pipeline_mode = #tpu.pipeline_mode<synchronous>, transform_indices = @transform_10, window_bounds = array<i64: 8, 8>}, {transform_indices = @transform_11, window_bounds = array<i64: 2, 8>}]} {
    %c0 = arith.constant 0 : index
    %c0_0 = arith.constant 0 : index
    %0 = vector.load %arg1[%c0, %c0_0] : memref<2x32xf32, #tpu.memory_space<vmem>>, vector<2x32xf32>
    %c0_1 = arith.constant 0 : index
    %c0_2 = arith.constant 0 : index
    %1 = vector.load %arg2[%c0_1, %c0_2] : memref<32x16xf32, #tpu.memory_space<vmem>>, vector<32x16xf32>
    %cst = arith.constant dense<0.000000e+00> : vector<2x16xf32>
    %2 = tpu.matmul %0, %1, %cst {dimension_numbers = #tpu.dot_dimension_numbers<[1], [0], [0], [1], [0, 0, 1, 1], [], []>} : vector<2x32xf32>, vector<32x16xf32>, vector<2x16xf32> -> vector<2x16xf32>
    %c0_3 = arith.constant 0 : index
    %c0_4 = arith.constant 0 : index
    %3 = vector.load %arg3[%c0_3, %c0_4] : memref<1x16xf32, #tpu.memory_space<vmem>>, vector<1x16xf32>
    %4 = vector.broadcast %3 : vector<1x16xf32> to vector<2x16xf32>
    %5 = arith.addf %2, %4 : vector<2x16xf32>
    %c0_5 = arith.constant 0 : index
    %c0_6 = arith.constant 0 : index
    %6 = vector.load %arg4[%c0_5, %c0_6] : memref<1x16xf32, #tpu.memory_space<vmem>>, vector<1x16xf32>
    %c0_7 = arith.constant 0 : index
    %c0_8 = arith.constant 0 : index
    %7 = vector.load %arg5[%c0_7, %c0_8] : memref<1x16xf32, #tpu.memory_space<vmem>>, vector<1x16xf32>
    %cst_9 = arith.constant dense<0.000000e+00> : vector<2xf32>
    %8 = vector.multi_reduction <add>, %5, %cst_9 [1] : vector<2x16xf32> to vector<2xf32>
    %9 = vector.shape_cast %8 : vector<2xf32> to vector<2x1xf32>
    %cst_10 = arith.constant 1.600000e+01 : f32
    %10 = vector.broadcast %cst_10 : f32 to vector<2x1xf32>
    %11 = arith.divf %9, %10 : vector<2x1xf32>
    %12 = vector.broadcast %11 : vector<2x1xf32> to vector<2x16xf32>
    %13 = arith.subf %5, %12 : vector<2x16xf32>
    %14 = arith.mulf %13, %13 : vector<2x16xf32>
    %cst_11 = arith.constant dense<0.000000e+00> : vector<2xf32>
    %15 = vector.multi_reduction <add>, %14, %cst_11 [1] : vector<2x16xf32> to vector<2xf32>
    %16 = vector.shape_cast %15 : vector<2xf32> to vector<2x1xf32>
    %cst_12 = arith.constant 1.600000e+01 : f32
    %17 = vector.broadcast %cst_12 : f32 to vector<2x1xf32>
    %18 = arith.divf %16, %17 : vector<2x1xf32>
    %cst_13 = arith.constant 9.99999974E-6 : f32
    %19 = vector.broadcast %cst_13 : f32 to vector<2x1xf32>
    %20 = arith.addf %18, %19 : vector<2x1xf32>
    %21 = math.rsqrt %20 : vector<2x1xf32>
    %22 = vector.broadcast %21 : vector<2x1xf32> to vector<2x16xf32>
    %23 = arith.mulf %13, %22 : vector<2x16xf32>
    %24 = vector.broadcast %6 : vector<1x16xf32> to vector<2x16xf32>
    %25 = arith.mulf %23, %24 : vector<2x16xf32>
    %26 = vector.broadcast %7 : vector<1x16xf32> to vector<2x16xf32>
    %27 = arith.addf %25, %26 : vector<2x16xf32>
    %cst_14 = arith.constant 5.000000e-01 : f32
    %28 = vector.broadcast %cst_14 : f32 to vector<2x16xf32>
    %29 = arith.mulf %28, %27 : vector<2x16xf32>
    %cst_15 = arith.constant 0.707106769 : f32
    %30 = vector.broadcast %cst_15 : f32 to vector<2x16xf32>
    %31 = arith.mulf %27, %30 : vector<2x16xf32>
    %32 = math.absf %31 : vector<2x16xf32>
    %cst_16 = arith.constant 0.327591091 : f32
    %33 = vector.broadcast %cst_16 : f32 to vector<2x16xf32>
    %34 = arith.mulf %33, %32 : vector<2x16xf32>
    %cst_17 = arith.constant 1.000000e+00 : f32
    %35 = vector.broadcast %cst_17 : f32 to vector<2x16xf32>
    %36 = arith.addf %35, %34 : vector<2x16xf32>
    %cst_18 = arith.constant 1.000000e+00 : f32
    %37 = vector.broadcast %cst_18 : f32 to vector<2x16xf32>
    %38 = arith.divf %37, %36 : vector<2x16xf32>
    %cst_19 = arith.constant 1.06140542 : f32
    %39 = vector.broadcast %cst_19 : f32 to vector<2x16xf32>
    %40 = arith.mulf %39, %38 : vector<2x16xf32>
    %cst_20 = arith.constant -1.45315206 : f32
    %41 = vector.broadcast %cst_20 : f32 to vector<2x16xf32>
    %42 = arith.addf %40, %41 : vector<2x16xf32>
    %43 = arith.mulf %42, %38 : vector<2x16xf32>
    %cst_21 = arith.constant 1.42141378 : f32
    %44 = vector.broadcast %cst_21 : f32 to vector<2x16xf32>
    %45 = arith.addf %43, %44 : vector<2x16xf32>
    %46 = arith.mulf %45, %38 : vector<2x16xf32>
    %cst_22 = arith.constant -0.284496725 : f32
    %47 = vector.broadcast %cst_22 : f32 to vector<2x16xf32>
    %48 = arith.addf %46, %47 : vector<2x16xf32>
    %49 = arith.mulf %48, %38 : vector<2x16xf32>
    %cst_23 = arith.constant 0.254829586 : f32
    %50 = vector.broadcast %cst_23 : f32 to vector<2x16xf32>
    %51 = arith.addf %49, %50 : vector<2x16xf32>
    %52 = arith.mulf %51, %38 : vector<2x16xf32>
    %cst_24 = arith.constant 0.000000e+00 : f32
    %53 = vector.broadcast %cst_24 : f32 to vector<2x16xf32>
    %54 = arith.subf %53, %32 : vector<2x16xf32>
    %55 = arith.mulf %54, %32 : vector<2x16xf32>
    %56 = math.exp %55 : vector<2x16xf32>
    %57 = arith.mulf %52, %56 : vector<2x16xf32>
    %cst_25 = arith.constant 1.000000e+00 : f32
    %58 = vector.broadcast %cst_25 : f32 to vector<2x16xf32>
    %59 = arith.subf %58, %57 : vector<2x16xf32>
    %cst_26 = arith.constant 0.000000e+00 : f32
    %60 = vector.broadcast %cst_26 : f32 to vector<2x16xf32>
    %61 = arith.cmpf olt, %31, %60 : vector<2x16xf32>
    %cst_27 = arith.constant 0.000000e+00 : f32
    %62 = vector.broadcast %cst_27 : f32 to vector<2x16xf32>
    %63 = arith.subf %62, %59 : vector<2x16xf32>
    %64 = arith.select %61, %63, %59 : vector<2x16xi1>, vector<2x16xf32>
    %cst_28 = arith.constant 1.000000e+00 : f32
    %65 = vector.broadcast %cst_28 : f32 to vector<2x16xf32>
    %66 = arith.addf %65, %64 : vector<2x16xf32>
    %67 = arith.mulf %29, %66 : vector<2x16xf32>
    %c0_29 = arith.constant 0 : index
    %c0_30 = arith.constant 0 : index
    %68 = vector.load %arg6[%c0_29, %c0_30] : memref<16x8xf32, #tpu.memory_space<vmem>>, vector<16x8xf32>
    %cst_31 = arith.constant dense<0.000000e+00> : vector<2x8xf32>
    %69 = tpu.matmul %67, %68, %cst_31 {dimension_numbers = #tpu.dot_dimension_numbers<[1], [0], [0], [1], [0, 0, 1, 1], [], []>} : vector<2x16xf32>, vector<16x8xf32>, vector<2x8xf32> -> vector<2x8xf32>
    %c0_32 = arith.constant 0 : index
    %c0_33 = arith.constant 0 : index
    %70 = vector.load %arg7[%c0_32, %c0_33] : memref<1x8xf32, #tpu.memory_space<vmem>>, vector<1x8xf32>
    %71 = vector.broadcast %70 : vector<1x8xf32> to vector<2x8xf32>
    %72 = arith.addf %69, %71 : vector<2x8xf32>
    %c0_34 = arith.constant 0 : index
    %c0_35 = arith.constant 0 : index
    %73 = vector.load %arg8[%c0_34, %c0_35] : memref<1x8xf32, #tpu.memory_space<vmem>>, vector<1x8xf32>
    %c0_36 = arith.constant 0 : index
    %c0_37 = arith.constant 0 : index
    %74 = vector.load %arg9[%c0_36, %c0_37] : memref<1x8xf32, #tpu.memory_space<vmem>>, vector<1x8xf32>
    %cst_38 = arith.constant dense<0.000000e+00> : vector<2xf32>
    %75 = vector.multi_reduction <add>, %72, %cst_38 [1] : vector<2x8xf32> to vector<2xf32>
    %76 = vector.shape_cast %75 : vector<2xf32> to vector<2x1xf32>
    %cst_39 = arith.constant 8.000000e+00 : f32
    %77 = vector.broadcast %cst_39 : f32 to vector<2x1xf32>
    %78 = arith.divf %76, %77 : vector<2x1xf32>
    %79 = vector.broadcast %78 : vector<2x1xf32> to vector<2x8xf32>
    %80 = arith.subf %72, %79 : vector<2x8xf32>
    %81 = arith.mulf %80, %80 : vector<2x8xf32>
    %cst_40 = arith.constant dense<0.000000e+00> : vector<2xf32>
    %82 = vector.multi_reduction <add>, %81, %cst_40 [1] : vector<2x8xf32> to vector<2xf32>
    %83 = vector.shape_cast %82 : vector<2xf32> to vector<2x1xf32>
    %cst_41 = arith.constant 8.000000e+00 : f32
    %84 = vector.broadcast %cst_41 : f32 to vector<2x1xf32>
    %85 = arith.divf %83, %84 : vector<2x1xf32>
    %cst_42 = arith.constant 9.99999974E-6 : f32
    %86 = vector.broadcast %cst_42 : f32 to vector<2x1xf32>
    %87 = arith.addf %85, %86 : vector<2x1xf32>
    %88 = math.rsqrt %87 : vector<2x1xf32>
    %89 = vector.broadcast %88 : vector<2x1xf32> to vector<2x8xf32>
    %90 = arith.mulf %80, %89 : vector<2x8xf32>
    %91 = vector.broadcast %73 : vector<1x8xf32> to vector<2x8xf32>
    %92 = arith.mulf %90, %91 : vector<2x8xf32>
    %93 = vector.broadcast %74 : vector<1x8xf32> to vector<2x8xf32>
    %94 = arith.addf %92, %93 : vector<2x8xf32>
    %cst_43 = arith.constant 5.000000e-01 : f32
    %95 = vector.broadcast %cst_43 : f32 to vector<2x8xf32>
    %96 = arith.mulf %95, %94 : vector<2x8xf32>
    %cst_44 = arith.constant 0.707106769 : f32
    %97 = vector.broadcast %cst_44 : f32 to vector<2x8xf32>
    %98 = arith.mulf %94, %97 : vector<2x8xf32>
    %99 = math.absf %98 : vector<2x8xf32>
    %cst_45 = arith.constant 0.327591091 : f32
    %100 = vector.broadcast %cst_45 : f32 to vector<2x8xf32>
    %101 = arith.mulf %100, %99 : vector<2x8xf32>
    %cst_46 = arith.constant 1.000000e+00 : f32
    %102 = vector.broadcast %cst_46 : f32 to vector<2x8xf32>
    %103 = arith.addf %102, %101 : vector<2x8xf32>
    %cst_47 = arith.constant 1.000000e+00 : f32
    %104 = vector.broadcast %cst_47 : f32 to vector<2x8xf32>
    %105 = arith.divf %104, %103 : vector<2x8xf32>
    %cst_48 = arith.constant 1.06140542 : f32
    %106 = vector.broadcast %cst_48 : f32 to vector<2x8xf32>
    %107 = arith.mulf %106, %105 : vector<2x8xf32>
    %cst_49 = arith.constant -1.45315206 : f32
    %108 = vector.broadcast %cst_49 : f32 to vector<2x8xf32>
    %109 = arith.addf %107, %108 : vector<2x8xf32>
    %110 = arith.mulf %109, %105 : vector<2x8xf32>
    %cst_50 = arith.constant 1.42141378 : f32
    %111 = vector.broadcast %cst_50 : f32 to vector<2x8xf32>
    %112 = arith.addf %110, %111 : vector<2x8xf32>
    %113 = arith.mulf %112, %105 : vector<2x8xf32>
    %cst_51 = arith.constant -0.284496725 : f32
    %114 = vector.broadcast %cst_51 : f32 to vector<2x8xf32>
    %115 = arith.addf %113, %114 : vector<2x8xf32>
    %116 = arith.mulf %115, %105 : vector<2x8xf32>
    %cst_52 = arith.constant 0.254829586 : f32
    %117 = vector.broadcast %cst_52 : f32 to vector<2x8xf32>
    %118 = arith.addf %116, %117 : vector<2x8xf32>
    %119 = arith.mulf %118, %105 : vector<2x8xf32>
    %cst_53 = arith.constant 0.000000e+00 : f32
    %120 = vector.broadcast %cst_53 : f32 to vector<2x8xf32>
    %121 = arith.subf %120, %99 : vector<2x8xf32>
    %122 = arith.mulf %121, %99 : vector<2x8xf32>
    %123 = math.exp %122 : vector<2x8xf32>
    %124 = arith.mulf %119, %123 : vector<2x8xf32>
    %cst_54 = arith.constant 1.000000e+00 : f32
    %125 = vector.broadcast %cst_54 : f32 to vector<2x8xf32>
    %126 = arith.subf %125, %124 : vector<2x8xf32>
    %cst_55 = arith.constant 0.000000e+00 : f32
    %127 = vector.broadcast %cst_55 : f32 to vector<2x8xf32>
    %128 = arith.cmpf olt, %98, %127 : vector<2x8xf32>
    %cst_56 = arith.constant 0.000000e+00 : f32
    %129 = vector.broadcast %cst_56 : f32 to vector<2x8xf32>
    %130 = arith.subf %129, %126 : vector<2x8xf32>
    %131 = arith.select %128, %130, %126 : vector<2x8xi1>, vector<2x8xf32>
    %cst_57 = arith.constant 1.000000e+00 : f32
    %132 = vector.broadcast %cst_57 : f32 to vector<2x8xf32>
    %133 = arith.addf %132, %131 : vector<2x8xf32>
    %134 = arith.mulf %96, %133 : vector<2x8xf32>
    %c0_58 = arith.constant 0 : index
    %c0_59 = arith.constant 0 : index
    %135 = vector.load %arg10[%c0_58, %c0_59] : memref<8x8xf32, #tpu.memory_space<vmem>>, vector<8x8xf32>
    %cst_60 = arith.constant dense<0.000000e+00> : vector<2x8xf32>
    %136 = tpu.matmul %134, %135, %cst_60 {dimension_numbers = #tpu.dot_dimension_numbers<[1], [0], [0], [1], [0, 0, 1, 1], [], []>} : vector<2x8xf32>, vector<8x8xf32>, vector<2x8xf32> -> vector<2x8xf32>
    %c0_61 = arith.constant 0 : index
    %c0_62 = arith.constant 0 : index
    %137 = vector.load %arg11[%c0_61, %c0_62] : memref<8x8xf32, #tpu.memory_space<vmem>>, vector<1x8xf32>
    %138 = vector.broadcast %137 : vector<1x8xf32> to vector<2x8xf32>
    %139 = arith.addf %136, %138 : vector<2x8xf32>
    %c1 = arith.constant 1 : index
    %c0_63 = arith.constant 0 : index
    %140 = vector.load %arg11[%c1, %c0_63] : memref<8x8xf32, #tpu.memory_space<vmem>>, vector<1x8xf32>
    %c2 = arith.constant 2 : index
    %c0_64 = arith.constant 0 : index
    %141 = vector.load %arg11[%c2, %c0_64] : memref<8x8xf32, #tpu.memory_space<vmem>>, vector<1x8xf32>
    %142 = vector.broadcast %140 : vector<1x8xf32> to vector<2x8xf32>
    %143 = arith.maximumf %142, %139 : vector<2x8xf32>
    %144 = vector.broadcast %141 : vector<1x8xf32> to vector<2x8xf32>
    %145 = arith.minimumf %144, %143 : vector<2x8xf32>
    %cst_65 = arith.constant 0.000000e+00 : f32
    %146 = vector.broadcast %cst_65 : f32 to vector<2x8xf32>
    %147 = arith.subf %146, %145 : vector<2x8xf32>
    %148 = math.exp %147 : vector<2x8xf32>
    %cst_66 = arith.constant 1.000000e+00 : f32
    %149 = vector.broadcast %cst_66 : f32 to vector<2x8xf32>
    %150 = arith.addf %149, %148 : vector<2x8xf32>
    %cst_67 = arith.constant 1.000000e+00 : f32
    %151 = vector.broadcast %cst_67 : f32 to vector<2x8xf32>
    %152 = arith.divf %151, %150 : vector<2x8xf32>
    %c3 = arith.constant 3 : index
    %c0_68 = arith.constant 0 : index
    %153 = vector.load %arg11[%c3, %c0_68] : memref<8x8xf32, #tpu.memory_space<vmem>>, vector<1x8xf32>
    %c4 = arith.constant 4 : index
    %c0_69 = arith.constant 0 : index
    %154 = vector.load %arg11[%c4, %c0_69] : memref<8x8xf32, #tpu.memory_space<vmem>>, vector<1x8xf32>
    %155 = vector.broadcast %154 : vector<1x8xf32> to vector<2x8xf32>
    %156 = arith.mulf %155, %152 : vector<2x8xf32>
    %157 = vector.broadcast %153 : vector<1x8xf32> to vector<2x8xf32>
    %158 = arith.addf %157, %156 : vector<2x8xf32>
    %c0_70 = arith.constant 0 : index
    %c0_71 = arith.constant 0 : index
    %159 = vector.load %arg12[%c0_70, %c0_71] : memref<2x8xf32, #tpu.memory_space<vmem>>, vector<2x8xf32>
    tpu.vector_store %arg12[%c0_70, %c0_71], %158 {strides = array<i32>} : memref<2x8xf32, #tpu.memory_space<vmem>>, vector<2x8xf32>,
    return
  }
  func.func @transform_0(%arg0: i32) -> (i32, i32) {
    %c0_i32 = arith.constant 0 : i32
    %c0_i32_0 = arith.constant 0 : i32
    return %arg0, %c0_i32 : i32, i32
  }
  func.func @transform_1(%arg0: i32) -> (i32, i32) {
    %c0_i32 = arith.constant 0 : i32
    %c0_i32_0 = arith.constant 0 : i32
    %c0_i32_1 = arith.constant 0 : i32
    return %c0_i32, %c0_i32_0 : i32, i32
  }
  func.func @transform_2(%arg0: i32) -> (i32, i32) {
    %c0_i32 = arith.constant 0 : i32
    %c0_i32_0 = arith.constant 0 : i32
    %c0_i32_1 = arith.constant 0 : i32
    return %c0_i32, %c0_i32_0 : i32, i32
  }
  func.func @transform_3(%arg0: i32) -> (i32, i32) {
    %c0_i32 = arith.constant 0 : i32
    %c0_i32_0 = arith.constant 0 : i32
    %c0_i32_1 = arith.constant 0 : i32
    return %c0_i32, %c0_i32_0 : i32, i32
  }
  func.func @transform_4(%arg0: i32) -> (i32, i32) {
    %c0_i32 = arith.constant 0 : i32
    %c0_i32_0 = arith.constant 0 : i32
    %c0_i32_1 = arith.constant 0 : i32
    return %c0_i32, %c0_i32_0 : i32, i32
  }
  func.func @transform_5(%arg0: i32) -> (i32, i32) {
    %c0_i32 = arith.constant 0 : i32
    %c0_i32_0 = arith.constant 0 : i32
    %c0_i32_1 = arith.constant 0 : i32
    return %c0_i32, %c0_i32_0 : i32, i32
  }
  func.func @transform_6(%arg0: i32) -> (i32, i32) {
    %c0_i32 = arith.constant 0 : i32
    %c0_i32_0 = arith.constant 0 : i32
    %c0_i32_1 = arith.constant 0 : i32
    return %c0_i32, %c0_i32_0 : i32, i32
  }
  func.func @transform_7(%arg0: i32) -> (i32, i32) {
    %c0_i32 = arith.constant 0 : i32
    %c0_i32_0 = arith.constant 0 : i32
    %c0_i32_1 = arith.constant 0 : i32
    return %c0_i32, %c0_i32_0 : i32, i32
  }
  func.func @transform_8(%arg0: i32) -> (i32, i32) {
    %c0_i32 = arith.constant 0 : i32
    %c0_i32_0 = arith.constant 0 : i32
    %c0_i32_1 = arith.constant 0 : i32
    return %c0_i32, %c0_i32_0 : i32, i32
  }
  func.func @transform_9(%arg0: i32) -> (i32, i32) {
    %c0_i32 = arith.constant 0 : i32
    %c0_i32_0 = arith.constant 0 : i32
    %c0_i32_1 = arith.constant 0 : i32
    return %c0_i32, %c0_i32_0 : i32, i32
  }
  func.func @transform_10(%arg0: i32) -> (i32, i32) {
    %c0_i32 = arith.constant 0 : i32
    %c0_i32_0 = arith.constant 0 : i32
    %c0_i32_1 = arith.constant 0 : i32
    return %c0_i32, %c0_i32_0 : i32, i32
  }
  func.func @transform_11(%arg0: i32) -> (i32, i32) {
    %c0_i32 = arith.constant 0 : i32
    %c0_i32_0 = arith.constant 0 : i32
    return %arg0, %c0_i32 : i32, i32
  }
}

</mosaic_0001>

<bundles_post_ra>
// kernel: tpu_custom_call.1
= control target key start
LH: loop header
LB: loop body
LE: loop exit
PB: predicated region body
PF: predicated region fallthrough
CT: control target
= control target key end

     0   :  { %v537_v1 = vmov 0.0   ;;  %vm538_vm0 = vmmov 0   ;;  %s676_s0 = inlined_call_operand.vmem [shape: f32[2,32], index: 0, kind: input, shape index: {}]   ;;  %s677_s1 = inlined_call_operand.vmem [shape: f32[32,16], index: 1, kind: input, shape index: {}]   ;;  %s678_s2 = inlined_call_operand.vmem [shape: f32[1,16], index: 2, kind: input, shape index: {}]   ;;  %s679_s3 = inlined_call_operand.vmem [shape: f32[1,16], index: 3, kind: input, shape index: {}]   ;;  %s680_s4 = inlined_call_operand.vmem [shape: f32[1,16], index: 4, kind: input, shape index: {}]   ;;  %s681_s5 = inlined_call_operand.vmem [shape: f32[16,8], index: 5, kind: input, shape index: {}]   ;;  %s682_s6 = inlined_call_operand.vmem [shape: f32[1,8], index: 6, kind: input, shape index: {}]   ;;  %s683_s7 = inlined_call_operand.vmem [shape: f32[1,8], index: 7, kind: input, shape index: {}]   ;;  %s684_s8 = inlined_call_operand.vmem [shape: f32[1,8], index: 8, kind: input, shape index: {}]   ;;  %s685_s9 = inlined_call_operand.vmem [shape: f32[8,8], index: 9, kind: input, shape index: {}]   ;;  %s686_s10 = inlined_call_operand.vmem [shape: f32[8,8], index: 10, kind: input, shape index: {}]   ;;  %s687_s11 = inlined_call_operand.hbm [shape: f32[2,8], index: 11, kind: output, shape index: {}]  }
   0x1   :  { %v43_v0 = vld [vmem:[%s677_s1 + $0x18] sm:$0xff]  ;;  %473 = vmatprep.subr.mxu0 %v537_v1  ;;  %v42_v2 = vld [vmem:[%s677_s1 + $0x10] sm:$0xff]  ;;  %481 = vmatprep.mubr.msk.f32.mxu0 %vm538_vm0, %v537_v1 }
   0x2   :  { %474 = vmatpush3.msra.mxu0 %v43_v0  ;;  %484 = vmatprep.subr.mxu1 %v537_v1 }
   0x3   :  { %16 = vsyncpa [#allocation3], 0  ;;  %475 = vmatprep.subr.mxu0 %v537_v1  ;;  %v41_v3 = vld [vmem:[%s677_s1 + $0x8] sm:$0xff]  ;;  %488 = vmatprep.mubr.msk.f32.mxu1 %vm538_vm0, %v537_v1  ;;  %v40_v4 = vld [vmem:[%s677_s1] sm:$0xff]  ;;  %vm51_vm1 = vcmask 261120   ;;  %vm127_vm2 = vcmask 123904  }
   0x4   :  { %476 = vmatpush3.msra.mxu0 %v42_v2  ;;  %v39_v5 = vld [vmem:[%s676_s0] sm:$0x3]  ;;  %v184_v16 = vld [vmem:[%s681_s5 + $0x8] sm:$0xff]  ;;  %vm192_vm4 = vcmask 130048   ;;  %vm268_vm5 = vcmask 58368   ;;  %vm330_vm7 = vcmask 64512  }
   0x5   :  { %477 = vmatprep.subr.mxu0 %v537_v1  ;;  %v449_v6 = vld [vmem:[%s678_s2] ss:$0 sm:$0xff]  ;;  %485 = vmatpush3.msra.mxu1 %v184_v16  ;;  %s539_s26 = smov [#allocation2]  }
   0x6   :  { %478 = vmatpush3.msra.mxu0 %v41_v3  ;;  %v183_v17 = vld [vmem:[%s681_s5] sm:$0xff]  ;;  %486 = vmatprep.subr.mxu1 %v537_v1  ;;  %s441_s27 = sshll.u32 %s539_s26, 4  ;;  %s442_s27 = int_to_ptr.vmem [resolvable:$true] %s441_s27 }
   0x7   :  { %479 = vmatprep.subr.mxu0 %v537_v1  ;;  %487 = vmatpush3.msra.mxu1 %v183_v17  ;;  %v451_v22 = vld [vmem:[%s679_s3] ss:$0 sm:$0xff]  ;;  %s515_s28 = scalar_lea.vmem %s442_s27, 32  ;;  %p520_p1 = scmp.lt.s32.totalorder %s442_s27, %s442_s27 }
   0x8   :  { %480 = vmatpush3.msra.mxu0 %v40_v4  ;;  %491 = vmatprep.subr.mxu1 %v537_v1  ;;  %v452_v24 = vld [vmem:[%s680_s4] ss:$0 sm:$0xff]  ;;  %p516_p0 = scmp.ne.s32.totalorder %s442_s27, %s515_s28  ;;  %p521_p2 = scmp.lt.s32.totalorder %s515_s28, %s515_s28 }
   0x9   :  { %482 = vmatmul.mubr.msk.f32.vlgmr.msra.gmra.mxu0 %vm51_vm1, %v39_v5  ;;  %v453_v52 = vld [vmem:[%s682_s6] ss:$0 sm:$0xff] }
   0xa   :  { %v324_v62 = vld [vmem:[%s685_s9] sm:$0xff]  ;;  %p522_p3 = por %p521_p2, %p520_p1 }
   0xb   :  { %v455_v3 = vld [vmem:[%s683_s7] ss:$0 sm:$0xff] }
   0xc   :  { %v456_v5 = vld [vmem:[%s684_s8] ss:$0 sm:$0xff]  ;;  %p523_p4 = pnand %p522_p3, %p516_p0 }
  0xc9   :  { %v121_v7 = vpop.f32.mrf.mxu0 }
  0xca   :  { %v122_v8 = vadd.f32 %v449_v6, %v121_v7 }
  0xcb   :  { %v483_v9 = vpop.f32.mrf.mxu0 }
  0xcc   :  { %v128_v10 = vsel %vm127_vm2, %v122_v8, 0.0 }
  0xcd   :  { %129 = vadd.xlane.f32.xlu0 %v128_v10 }
 0x156   :  { %v130_v11 = vpop.xlane.xlu0 %129 }
 0x157   :  { %v132_v12 = vmul.f32 0.0625, %v130_v11 }
 0x159   :  { %v133_v13 = vsub.f32 %v122_v8, %v132_v12 }
 0x15b   :  { %v134_v14 = vmul.f32 %v133_v13, %v133_v13 }
 0x15d   :  { %v135_v15 = vsel %vm127_vm2, %v134_v14, 0.0 }
 0x15e   :  { %136 = vadd.xlane.f32.xlu0 %v135_v15 }
 0x1e7   :  { %v137_v18 = vpop.xlane.xlu0 %136 }
 0x1e8   :  { %v138_v19 = vmul.f32 0.0625, %v137_v18 }
 0x1ea   :  { %v139_v20 = vadd.f32 1e-05, %v138_v19 }
 0x1ec   :  { %499 = vrsqrt.f32 %v139_v20 }
 0x1f9   :  { %v500_v21 = vpop.eup %499 }
 0x1fa   :  { %v141_v23 = vmul.f32 %v500_v21, %v133_v13 }
 0x1fc   :  { %v148_v25 = vmul.f32 %v451_v22, %v141_v23 }
 0x1fe   :  { %v155_v26 = vadd.f32 %v452_v24, %v148_v25 }
 0x200   :  { %v157_v27 = vmul.f32 0.70710677, %v155_v26  ;;  %v156_v49 = vmul.f32 0.5, %v155_v26 }
 0x202   :  { %v158_v28 = vand.u32 2147483647, %v157_v27  ;;  %vm178_vm3 = vcmp.lt.f32.partialorder %v157_v27, 0.0 }
 0x204   :  { %v159_v29 = vmul.f32 0.3275911, %v158_v28  ;;  %v172_v31 = vsub.f32 0.0, %v158_v28 }
 0x206   :  { %v160_v30 = vadd.f32 1.0, %v159_v29  ;;  %v173_v32 = vmul.f32 %v172_v31, %v158_v28 }
 0x208   :  { %501 = vrcp.f32 %v160_v30  ;;  %v174_v35 = vmul.f32 1.442695, %v173_v32 }
 0x20a   :  { %503 = vpow2.f32 %v174_v35  ;;  %v459_v35 = vld [vmem:[%s686_s10 + $0x1] ss:$0 sm:$0xff] }
 0x215   :  { %v502_v33 = vpop.eup %501 }
 0x216   :  { %v163_v34 = vmul.f32 1.0614054, %v502_v33 }
 0x217   :  { %v504_v44 = vpop.eup %503 }
 0x218   :  { %v164_v36 = vadd.f32 -1.4531521, %v163_v34 }
 0x21a   :  { %v165_v37 = vmul.f32 %v502_v33, %v164_v36 }
 0x21c   :  { %v166_v38 = vadd.f32 1.4214138, %v165_v37  ;;  %v460_v37 = vld [vmem:[%s686_s10 + $0x2] ss:$0 sm:$0xff] }
 0x21e   :  { %v167_v39 = vmul.f32 %v502_v33, %v166_v38 }
 0x220   :  { %v168_v40 = vadd.f32 -0.28449672, %v167_v39 }
 0x222   :  { %v169_v41 = vmul.f32 %v502_v33, %v168_v40 }
 0x224   :  { %v170_v42 = vadd.f32 0.2548296, %v169_v41 }
 0x226   :  { %v171_v43 = vmul.f32 %v502_v33, %v170_v42  ;;  %v457_v33 = vld [vmem:[%s686_s10] ss:$0 sm:$0xff] }
 0x228   :  { %v176_v45 = vmul.f32 %v504_v44, %v171_v43 }
 0x22a   :  { %v177_v46 = vsub.f32 1.0, %v176_v45  ;;  %v461_v45 = vld [vmem:[%s686_s10 + $0x4] ss:$0 sm:$0xff] }
 0x22c   :  { %v179_v47 = vsub.f32 0.0, %v177_v46 }
 0x22e   :  { %v180_v48 = vsel %vm178_vm3, %v179_v47, %v177_v46  ;;  %v462_v47 = vld [vmem:[%s686_s10 + $0x3] ss:$0 sm:$0xff] }
 0x22f   :  { %v181_v50 = vadd.f32 1.0, %v180_v48 }
 0x231   :  { %v182_v51 = vmul.f32 %v181_v50, %v156_v49 }
 0x233   :  { %489 = vmatmul.mubr.msk.f32.vlgmr.msra.gmra.mxu1 %vm192_vm4, %v182_v51 }
 0x234   :  { %493 = vmatprep.mubr.msk.f32.mxu1 %vm538_vm0, %v537_v1  ;;  %492 = vmatpush3.msra.mxu1 %v324_v62 }
 0x2f3   :  { %v262_v53 = vpop.f32.mrf.mxu1 }
 0x2f4   :  { %v263_v54 = vadd.f32 %v453_v52, %v262_v53 }
 0x2f5   :  { %v490_v55 = vpop.f32.mrf.mxu1 }
 0x2f6   :  { %v269_v56 = vsel %vm268_vm5, %v263_v54, 0.0 }
 0x2f7   :  { %270 = vadd.xlane.f32.xlu1 %v269_v56 }
 0x380   :  { %v271_v57 = vpop.xlane.xlu1 %270 }
 0x381   :  { %v273_v58 = vmul.f32 0.125, %v271_v57 }
 0x383   :  { %v274_v59 = vsub.f32 %v263_v54, %v273_v58 }
 0x385   :  { %v275_v60 = vmul.f32 %v274_v59, %v274_v59 }
 0x387   :  { %v276_v61 = vsel %vm268_vm5, %v275_v60, 0.0 }
 0x388   :  { %277 = vadd.xlane.f32.xlu1 %v276_v61 }
 0x411   :  { %v278_v63 = vpop.xlane.xlu1 %277 }
 0x412   :  { %v279_v0 = vmul.f32 0.125, %v278_v63 }
 0x414   :  { %v280_v1 = vadd.f32 1e-05, %v279_v0 }
 0x416   :  { %505 = vrsqrt.f32 %v280_v1 }
 0x423   :  { %v506_v2 = vpop.eup %505 }
 0x424   :  { %v282_v4 = vmul.f32 %v506_v2, %v274_v59 }
 0x426   :  { %v289_v6 = vmul.f32 %v455_v3, %v282_v4 }
 0x428   :  { %v296_v7 = vadd.f32 %v456_v5, %v289_v6 }
 0x42a   :  { %v298_v8 = vmul.f32 0.70710677, %v296_v7  ;;  %v297_v30 = vmul.f32 0.5, %v296_v7 }
 0x42c   :  { %v299_v9 = vand.u32 2147483647, %v298_v8  ;;  %vm319_vm6 = vcmp.lt.f32.partialorder %v298_v8, 0.0 }
 0x42e   :  { %v300_v10 = vmul.f32 0.3275911, %v299_v9  ;;  %v313_v12 = vsub.f32 0.0, %v299_v9 }
 0x430   :  { %v301_v11 = vadd.f32 1.0, %v300_v10  ;;  %v314_v13 = vmul.f32 %v313_v12, %v299_v9 }
 0x432   :  { %507 = vrcp.f32 %v301_v11  ;;  %v315_v16 = vmul.f32 1.442695, %v314_v13 }
 0x434   :  { %509 = vpow2.f32 %v315_v16 }
 0x43f   :  { %v508_v14 = vpop.eup %507 }
 0x440   :  { %v304_v15 = vmul.f32 1.0614054, %v508_v14 }
 0x441   :  { %v510_v25 = vpop.eup %509 }
 0x442   :  { %v305_v17 = vadd.f32 -1.4531521, %v304_v15 }
 0x444   :  { %v306_v18 = vmul.f32 %v508_v14, %v305_v17 }
 0x446   :  { %v307_v19 = vadd.f32 1.4214138, %v306_v18 }
 0x448   :  { %v308_v20 = vmul.f32 %v508_v14, %v307_v19 }
 0x44a   :  { %v309_v21 = vadd.f32 -0.28449672, %v308_v20 }
 0x44c   :  { %v310_v22 = vmul.f32 %v508_v14, %v309_v21 }
 0x44e   :  { %v311_v23 = vadd.f32 0.2548296, %v310_v22 }
 0x450   :  { %v312_v24 = vmul.f32 %v508_v14, %v311_v23 }
 0x452   :  { %v317_v26 = vmul.f32 %v510_v25, %v312_v24 }
 0x454   :  { %v318_v27 = vsub.f32 1.0, %v317_v26 }
 0x456   :  { %v320_v28 = vsub.f32 0.0, %v318_v27 }
 0x458   :  { %v321_v29 = vsel %vm319_vm6, %v320_v28, %v318_v27 }
 0x459   :  { %v322_v31 = vadd.f32 1.0, %v321_v29 }
 0x45b   :  { %v323_v32 = vmul.f32 %v322_v31, %v297_v30 }
 0x45d   :  { %494 = vmatmul.mubr.msk.f32.vlgmr.msra.gmra.mxu1 %vm330_vm7, %v323_v32 }
 0x51d   :  { %v400_v34 = vpop.f32.mrf.mxu1 }
 0x51e   :  { %v401_v36 = vadd.f32 %v457_v33, %v400_v34 }
 0x51f   :  { %v495_v38 = vpop.f32.mrf.mxu1 }
 0x520   :  { %v410_v39 = vmax.f32 %v459_v35, %v401_v36 }
 0x522   :  { %v415_v40 = vmin.f32 %v460_v37, %v410_v39 }
 0x524   :  { %v416_v41 = vsub.f32 0.0, %v415_v40 }
 0x526   :  { %v417_v42 = vmul.f32 1.442695, %v416_v41 }
 0x528   :  { %511 = vpow2.f32 %v417_v42 }
 0x535   :  { %v512_v43 = vpop.eup %511 }
 0x536   :  { %v419_v44 = vadd.f32 1.0, %v512_v43 }
 0x538   :  { %513 = vrcp.f32 %v419_v44 }
 0x545   :  { %v514_v46 = vpop.eup %513 }
 0x546   :  { %v428_v48 = vmul.f32 %v514_v46, %v461_v45 }
 0x548   :  { %v433_v49 = vadd.f32 %v462_v47, %v428_v48 }
 0x54a   :  { %434 = vst.msk [vmem:[#allocation2] sm:$0x3] %vm268_vm5, %v433_v49 }
 0x54b   :  { %526 = shalt.err (!%p523_p4)
}
 0x54c   :  { %444 = dma.vmem_to_hbm [thread:$0]  %s442_s27, 32, %s687_s11, [#allocation3]  }
 0x54d   :  { %535 = dma.done.wait [#allocation3], 32  }
 0x54e   :  { %536 = vsyncadd [#allocation3], 4294967264 }
 0x54f   :  { %448 = vsyncpa [#allocation3], 1 }

</bundles_post_ra>
